<compile_context>
chip_gen: v7x
topology: tpu7x:2x2x1
jax: 0.10.0
libtpu: 0.0.40
codegen_flags: <defaults>
</compile_context>

<pallas_src>
import functools

import jax
import jax.numpy as jnp
from jax.experimental import pallas as pl
from jax.experimental.pallas import tpu as pltpu


def _make_sinusoid_weight(num_embeddings: int, embedding_dim: int,
                          base: int = 10000, scale: float = None) -> jnp.ndarray:
    """Deterministic parameter setup, mirrors the PyTorch __init__ exactly."""
    assert embedding_dim % 2 == 0
    if scale is None:
        scale = embedding_dim ** (-0.5)
    assert abs(scale) <= 1
    positions = jnp.arange(num_embeddings, dtype=jnp.float32)          # (N,)
    i = jnp.arange(embedding_dim // 2, dtype=jnp.float32)              # (D/2,)
    freqs = positions[:, None] / (base ** (2.0 * i / embedding_dim))   # (N, D/2)
    # stack([sin, cos]).permute(1,2,0).view(N, D) -> interleave sin/cos per freq
    weight = jnp.stack([jnp.sin(freqs), jnp.cos(freqs)], axis=0)       # (2, N, D/2)
    weight = jnp.transpose(weight, (1, 2, 0)).reshape(num_embeddings, embedding_dim)
    return (weight * scale).astype(jnp.float32)


_UNROLL = 8  # row copies per fori_loop iteration (token_block is a multiple of 8)


def _gather_kernel(idx_ref, w_ref, o_ref):
    # idx_ref: (t_pad,) int32 in SMEM  -- scalar-prefetched token indices
    # w_ref:   (N, D)  float   in VMEM -- full sinusoid table (resident, fetched once)
    # o_ref:   (TB, D) out block       -- gathered rows
    tb = o_ref.shape[0]
    base = pl.program_id(0) * tb

    def body(j, carry):
        i0 = pl.multiple_of(j * _UNROLL, _UNROLL)
        for u in range(_UNROLL):                      # manual unroll: 8 rows / iter
            i = i0 + u
            row = idx_ref[base + i]                   # scalar read from SMEM
            o_ref[pl.ds(i, 1), :] = w_ref[pl.ds(row, 1), :].astype(o_ref.dtype)
        return carry

    jax.lax.fori_loop(0, tb // _UNROLL, body, 0)


@functools.partial(jax.jit, static_argnames=("token_block", "out_dtype"))
def sinusoid_positional_encoding(x: jnp.ndarray, weight: jnp.ndarray,
                                 token_block: int = 512,
                                 out_dtype=jnp.float32) -> jnp.ndarray:
    """Equivalent of PyTorch forward: weight[x]."""
    n, d = weight.shape
    orig_shape = x.shape
    flat = x.reshape(-1).astype(jnp.int32)
    flat = jnp.clip(flat, 0, n - 1)          # keep every gather index in range
    t = flat.shape[0]

    # Tokens per grid step: multiple of 8 (sublane tiling), no larger than needed.
    tb = int(min(token_block, -(-t // 8) * 8))
    tb = max(8, (tb // 8) * 8)
    t_pad = -(-t // tb) * tb
    flat = jnp.pad(flat, (0, t_pad - t))      # pad with (valid) index 0
    num_blocks = t_pad // tb

    out = pl.pallas_call(
        _gather_kernel,
        out_shape=jax.ShapeDtypeStruct((t_pad, d), out_dtype),
        grid_spec=pltpu.PrefetchScalarGridSpec(
            num_scalar_prefetch=1,            # flat indices -> SMEM
            grid=(num_blocks,),
            in_specs=[
                # Full table; constant block index -> the pipeline DMAs it once
                # per core and does not re-fetch across grid steps.
                pl.BlockSpec((n, d), lambda i, idx: (0, 0)),
            ],
            out_specs=pl.BlockSpec((tb, d), lambda i, idx: (i, 0)),
        ),
        compiler_params=pltpu.CompilerParams(
            dimension_semantics=("parallel",),   # shard token blocks across v7x TCs
            vmem_limit_bytes=32 * 1024 * 1024,   # raise v5e's 16 MiB scoped default
        ),
    )(flat, weight)

    return out[:t].reshape(orig_shape + (d,))


if __name__ == "__main__":
    num_embeddings = 64
    embedding_dim = 128          # multiple of 128 -> lane-dense output stores
    batch, seq = 2, 8

    weight = _make_sinusoid_weight(num_embeddings, embedding_dim)

    key = jax.random.PRNGKey(0)
    x = jax.random.randint(key, (batch, seq), 0, num_embeddings, dtype=jnp.int32)

    out = sinusoid_positional_encoding(x, weight)
    out = jax.block_until_ready(out)

    # Reference check: plain JAX embedding lookup (should be bit-exact).
    ref = weight[x]
    assert out.shape == (batch, seq, embedding_dim), out.shape
    assert jnp.array_equal(out, ref), "mismatch vs reference"

    print("KERNEL_OK")
</pallas_src>

<mosaic_0001>
module attributes {stable_mosaic.version = 11 : i64} {
  func.func @_gather_kernel(%arg0: i32, %arg1: memref<16xi32, #tpu.memory_space<smem>>, %arg2: memref<64x128xf32, #tpu.memory_space<vmem>>, %arg3: memref<16x128xf32, #tpu.memory_space<vmem>>) attributes {dimension_semantics = [#tpu.dimension_semantics<parallel>], iteration_bounds = array<i64: 1>, scalar_prefetch = 1 : i64, scratch_operands = 0 : i64, tpu.core_type = #tpu.core_type<tc>, window_params = [{pipeline_mode = #tpu.pipeline_mode<synchronous>, transform_indices = @transform_0, window_bounds = array<i64: 64, 128>}, {transform_indices = @transform_1, window_bounds = array<i64: 16, 128>}]} {
    %c16_i32 = arith.constant 16 : i32
    %0 = arith.muli %arg0, %c16_i32 : i32
    %c0_i32 = arith.constant 0 : i32
    %c2_i32 = arith.constant 2 : i32
    %1 = arith.addi %c0_i32, %c2_i32 : i32
    %c1_i32 = arith.constant 1 : i32
    scf.for %arg4 = %c0_i32 to %1 step %c1_i32  : i32 {
      %c8_i32 = arith.constant 8 : i32
      %2 = arith.muli %arg4, %c8_i32 : i32
      %3 = tpu.assume_multiple %2, 8 : i32
      %c0_i32_1 = arith.constant 0 : i32
      %4 = arith.addi %3, %c0_i32_1 : i32
      %5 = arith.addi %0, %4 : i32
      %6 = arith.index_cast %5 : i32 to index
      %7 = memref.load %arg1[%6] : memref<16xi32, #tpu.memory_space<smem>>
      %8 = arith.index_cast %7 : i32 to index
      %c0 = arith.constant 0 : index
      %9 = vector.load %arg2[%8, %c0] : memref<64x128xf32, #tpu.memory_space<vmem>>, vector<1x128xf32>
      %10 = arith.index_cast %4 : i32 to index
      %c0_2 = arith.constant 0 : index
      %11 = vector.load %arg3[%10, %c0_2] : memref<16x128xf32, #tpu.memory_space<vmem>>, vector<1x128xf32>
      tpu.vector_store %arg3[%10, %c0_2], %9 {strides = array<i32>} : memref<16x128xf32, #tpu.memory_space<vmem>>, vector<1x128xf32>,
      %c1_i32_3 = arith.constant 1 : i32
      %12 = arith.addi %3, %c1_i32_3 : i32
      %13 = arith.addi %0, %12 : i32
      %14 = arith.index_cast %13 : i32 to index
      %15 = memref.load %arg1[%14] : memref<16xi32, #tpu.memory_space<smem>>
      %16 = arith.index_cast %15 : i32 to index
      %c0_4 = arith.constant 0 : index
      %17 = vector.load %arg2[%16, %c0_4] : memref<64x128xf32, #tpu.memory_space<vmem>>, vector<1x128xf32>
      %18 = arith.index_cast %12 : i32 to index
      %c0_5 = arith.constant 0 : index
      %19 = vector.load %arg3[%18, %c0_5] : memref<16x128xf32, #tpu.memory_space<vmem>>, vector<1x128xf32>
      tpu.vector_store %arg3[%18, %c0_5], %17 {strides = array<i32>} : memref<16x128xf32, #tpu.memory_space<vmem>>, vector<1x128xf32>,
      %c2_i32_6 = arith.constant 2 : i32
      %20 = arith.addi %3, %c2_i32_6 : i32
      %21 = arith.addi %0, %20 : i32
      %22 = arith.index_cast %21 : i32 to index
      %23 = memref.load %arg1[%22] : memref<16xi32, #tpu.memory_space<smem>>
      %24 = arith.index_cast %23 : i32 to index
      %c0_7 = arith.constant 0 : index
      %25 = vector.load %arg2[%24, %c0_7] : memref<64x128xf32, #tpu.memory_space<vmem>>, vector<1x128xf32>
      %26 = arith.index_cast %20 : i32 to index
      %c0_8 = arith.constant 0 : index
      %27 = vector.load %arg3[%26, %c0_8] : memref<16x128xf32, #tpu.memory_space<vmem>>, vector<1x128xf32>
      tpu.vector_store %arg3[%26, %c0_8], %25 {strides = array<i32>} : memref<16x128xf32, #tpu.memory_space<vmem>>, vector<1x128xf32>,
      %c3_i32 = arith.constant 3 : i32
      %28 = arith.addi %3, %c3_i32 : i32
      %29 = arith.addi %0, %28 : i32
      %30 = arith.index_cast %29 : i32 to index
      %31 = memref.load %arg1[%30] : memref<16xi32, #tpu.memory_space<smem>>
      %32 = arith.index_cast %31 : i32 to index
      %c0_9 = arith.constant 0 : index
      %33 = vector.load %arg2[%32, %c0_9] : memref<64x128xf32, #tpu.memory_space<vmem>>, vector<1x128xf32>
      %34 = arith.index_cast %28 : i32 to index
      %c0_10 = arith.constant 0 : index
      %35 = vector.load %arg3[%34, %c0_10] : memref<16x128xf32, #tpu.memory_space<vmem>>, vector<1x128xf32>
      tpu.vector_store %arg3[%34, %c0_10], %33 {strides = array<i32>} : memref<16x128xf32, #tpu.memory_space<vmem>>, vector<1x128xf32>,
      %c4_i32 = arith.constant 4 : i32
      %36 = arith.addi %3, %c4_i32 : i32
      %37 = arith.addi %0, %36 : i32
      %38 = arith.index_cast %37 : i32 to index
      %39 = memref.load %arg1[%38] : memref<16xi32, #tpu.memory_space<smem>>
      %40 = arith.index_cast %39 : i32 to index
      %c0_11 = arith.constant 0 : index
      %41 = vector.load %arg2[%40, %c0_11] : memref<64x128xf32, #tpu.memory_space<vmem>>, vector<1x128xf32>
      %42 = arith.index_cast %36 : i32 to index
      %c0_12 = arith.constant 0 : index
      %43 = vector.load %arg3[%42, %c0_12] : memref<16x128xf32, #tpu.memory_space<vmem>>, vector<1x128xf32>
      tpu.vector_store %arg3[%42, %c0_12], %41 {strides = array<i32>} : memref<16x128xf32, #tpu.memory_space<vmem>>, vector<1x128xf32>,
      %c5_i32 = arith.constant 5 : i32
      %44 = arith.addi %3, %c5_i32 : i32
      %45 = arith.addi %0, %44 : i32
      %46 = arith.index_cast %45 : i32 to index
      %47 = memref.load %arg1[%46] : memref<16xi32, #tpu.memory_space<smem>>
      %48 = arith.index_cast %47 : i32 to index
      %c0_13 = arith.constant 0 : index
      %49 = vector.load %arg2[%48, %c0_13] : memref<64x128xf32, #tpu.memory_space<vmem>>, vector<1x128xf32>
      %50 = arith.index_cast %44 : i32 to index
      %c0_14 = arith.constant 0 : index
      %51 = vector.load %arg3[%50, %c0_14] : memref<16x128xf32, #tpu.memory_space<vmem>>, vector<1x128xf32>
      tpu.vector_store %arg3[%50, %c0_14], %49 {strides = array<i32>} : memref<16x128xf32, #tpu.memory_space<vmem>>, vector<1x128xf32>,
      %c6_i32 = arith.constant 6 : i32
      %52 = arith.addi %3, %c6_i32 : i32
      %53 = arith.addi %0, %52 : i32
      %54 = arith.index_cast %53 : i32 to index
      %55 = memref.load %arg1[%54] : memref<16xi32, #tpu.memory_space<smem>>
      %56 = arith.index_cast %55 : i32 to index
      %c0_15 = arith.constant 0 : index
      %57 = vector.load %arg2[%56, %c0_15] : memref<64x128xf32, #tpu.memory_space<vmem>>, vector<1x128xf32>
      %58 = arith.index_cast %52 : i32 to index
      %c0_16 = arith.constant 0 : index
      %59 = vector.load %arg3[%58, %c0_16] : memref<16x128xf32, #tpu.memory_space<vmem>>, vector<1x128xf32>
      tpu.vector_store %arg3[%58, %c0_16], %57 {strides = array<i32>} : memref<16x128xf32, #tpu.memory_space<vmem>>, vector<1x128xf32>,
      %c7_i32 = arith.constant 7 : i32
      %60 = arith.addi %3, %c7_i32 : i32
      %61 = arith.addi %0, %60 : i32
      %62 = arith.index_cast %61 : i32 to index
      %63 = memref.load %arg1[%62] : memref<16xi32, #tpu.memory_space<smem>>
      %64 = arith.index_cast %63 : i32 to index
      %c0_17 = arith.constant 0 : index
      %65 = vector.load %arg2[%64, %c0_17] : memref<64x128xf32, #tpu.memory_space<vmem>>, vector<1x128xf32>
      %66 = arith.index_cast %60 : i32 to index
      %c0_18 = arith.constant 0 : index
      %67 = vector.load %arg3[%66, %c0_18] : memref<16x128xf32, #tpu.memory_space<vmem>>, vector<1x128xf32>
      tpu.vector_store %arg3[%66, %c0_18], %65 {strides = array<i32>} : memref<16x128xf32, #tpu.memory_space<vmem>>, vector<1x128xf32>,
    }
    %c2_i32_0 = arith.constant 2 : i32
    return
  }
  func.func @transform_0(%arg0: i32, %arg1: memref<16xi32, #tpu.memory_space<smem>>) -> (i32, i32) {
    %c0_i32 = arith.constant 0 : i32
    %c0_i32_0 = arith.constant 0 : i32
    %c0_i32_1 = arith.constant 0 : i32
    return %c0_i32, %c0_i32_0 : i32, i32
  }
  func.func @transform_1(%arg0: i32, %arg1: memref<16xi32, #tpu.memory_space<smem>>) -> (i32, i32) {
    %c0_i32 = arith.constant 0 : i32
    %c0_i32_0 = arith.constant 0 : i32
    return %arg0, %c0_i32 : i32, i32
  }
}

</mosaic_0001>

<bundles_post_ra>
// kernel: sinusoid_positional_encoding.1
= control target key start
LH: loop header
LB: loop body
LE: loop exit
PB: predicated region body
PF: predicated region fallthrough
CT: control target
= control target key end

     0   :  { %s306_s0 = inlined_call_operand.vmem [shape: s32[16], index: 0, kind: input, shape index: {}]   ;;  %s307_s1 = inlined_call_operand.hbm [shape: f32[64,128], index: 1, kind: input, shape index: {}]   ;;  %s308_s2 = inlined_call_operand.hbm [shape: f32[16,128], index: 2, kind: output, shape index: {}]  }
   0x1   :  { %s7_s11 = sshll.u32 %s306_s0, 4  ;;  %s8_s11 = int_to_ptr.vmem [resolvable:$true] %s7_s11 }
   0x2   :  { %s174_s12 = scalar_lea.vmem %s8_s11, 16  ;;  %p179_p1 = scmp.lt.s32.totalorder %s8_s11, %s8_s11 }
   0x3   :  { %p175_p0 = scmp.ne.s32.totalorder %s8_s11, %s174_s12  ;;  %p180_p2 = scmp.lt.s32.totalorder %s174_s12, %s174_s12 }
   0x5   :  { %p181_p3 = por %p180_p2, %p179_p1 }
   0x7   :  { %p182_p4 = pnand %p181_p3, %p175_p0 }
   0x9   :  { %185 = shalt.err (!%p182_p4)  }
   0xa   :  { %s244_s13 = smov [#allocation3]  }
   0xb   :  { %10 = dma.vmem_to_smem %s8_s11, 16, %s244_s13, [#allocation2] }
   0xc   :  { %234 = dma.done.wait [#allocation2], 16 }
   0xd   :  { %235 = vsyncadd [#allocation2], 4294967280 }
   0xe   :  { %12 = sfence }
   0xf   :  { %13 = vsyncpa [#allocation5], 0 }
  0x10   :  { %14 = vsyncpa [#allocation6], 0  ;;  %s245_s14 = smov [#allocation4]   ;;  %s186_s17 = scalar_lea.hbm %s307_s1, 1024 }
  0x11   :  { %s20_s15 = sshll.u32 %s245_s14, 4  ;;  %p187_p5 = scmp.ne.s32.totalorder %s307_s1, %s186_s17  ;;  %s21_s15 = int_to_ptr.vmem [resolvable:$true] %s20_s15 }
  0x12   :  { %p190_p6 = scmp.lt.u32.totalorder %s186_s17, %s307_s1 }
  0x14   :  { %p192_p7 = pnand %p190_p6, %p187_p5 }
  0x16   :  { %195 = shalt.err (!%p192_p7)
}
  0x17   :  { %s196_s22 = scalar_lea.vmem %s21_s15, 1024  ;;  %p201_p9 = scmp.lt.s32.totalorder %s21_s15, %s21_s15 }
  0x18   :  { %p197_p8 = scmp.ne.s32.totalorder %s21_s15, %s196_s22  ;;  %p202_p10 = scmp.lt.s32.totalorder %s196_s22, %s196_s22 }
  0x1a   :  { %p203_p11 = por %p202_p10, %p201_p9 }
  0x1c   :  { %p204_p12 = pnand %p203_p11, %p197_p8 }
  0x1e   :  { %207 = shalt.err (!%p204_p12)
}
  0x1f   :  { %s246_s23 = smov 128   ;;  %s247_s24 = smov 8  }
  0x20   :  { %26 = dma.hbm_to_vmem [thread:$0]  %s307_s1, 1024, %s21_s15, [#allocation5], %s246_s23, %s246_s23, %s247_s24  }
  0x21   :  { %236 = dma.done.wait [#allocation5], 1024  }
  0x22   :  { %237 = vsyncadd [#allocation5], 4294966272  ;;  %s282_s27 = smov 0  }
  0x23 LB: > { %s146_s28 = sshll.u32 %s242_s27, 3  ;;  %s36_s27 = sadd.s32 1, %s242_s27   ;;  %s242_s27 = sphi %s282_s27, %s36_s27  }
  0x24   : > { %s39_s29 = sld [smem:[#allocation3 + %s146_s28]]  ;;  %s44_s30 = sadd.s32 1, %s146_s28 }
  0x25   : > { %s51_s3 = sadd.s32 2, %s146_s28  ;;  %s46_s4 = sld [smem:[#allocation3 + %s44_s30]] }
  0x26   : > { %s53_s5 = sld [smem:[#allocation3 + %s51_s3]]  ;;  %s58_s6 = sadd.s32 3, %s146_s28 }
  0x27   : > { %s65_s7 = sadd.s32 4, %s146_s28  ;;  %s60_s8 = sld [smem:[#allocation3 + %s58_s6]] }
  0x28   : > { %s67_s1 = sld [smem:[#allocation3 + %s65_s7]]  ;;  %s72_s9 = sadd.s32 5, %s146_s28 }
  0x29   : > { %s79_s10 = sadd.s32 6, %s146_s28  ;;  %s74_s11 = sld [smem:[#allocation3 + %s72_s9]] }
  0x2a   : > { %s40_s12 = scalar_lea.vmem [#allocation4], %s39_s29  ;;  %s81_s13 = sld [smem:[#allocation3 + %s79_s10]] }
  0x2b   : > { %v41_v0 = vld [vmem:[%s40_s12] sm:$0x1]  ;;  %s86_s14 = sadd.s32 7, %s146_s28  ;;  %s42_s15 = scalar_lea.vmem [#allocation7], %s146_s28 }
  0x2c   : > { %43 = vst [vmem:[%s42_s15] sm:$0x1] %v41_v0  ;;  %s47_s16 = scalar_lea.vmem [#allocation4], %s46_s4  ;;  %s54_s0 = scalar_lea.vmem [#allocation4], %s53_s5 }
  0x2d   : > { %v48_v1 = vld [vmem:[%s47_s16] sm:$0x1]  ;;  %s88_s17 = sld [smem:[#allocation3 + %s86_s14]]  ;;  %s61_s18 = scalar_lea.vmem [#allocation4], %s60_s8 }
  0x2e   : > { %v55_v2 = vld [vmem:[%s54_s0] sm:$0x1]  ;;  %148 = vst [vmem:[%s42_s15 + $0x1] sm:$0x1] %v48_v1  ;;  %s68_s19 = scalar_lea.vmem [#allocation4], %s67_s1  ;;  %p33_p13 = scmp.ge.s32.totalorder %s36_s27, 2  }
  0x2f   : > { %150 = vst [vmem:[%s42_s15 + $0x2] sm:$0x1] %v55_v2  ;;  %v62_v3 = vld [vmem:[%s61_s18] sm:$0x1]  ;;  %s75_s20 = scalar_lea.vmem [#allocation4], %s74_s11  ;;  %s248_s25 = smov (%p33_p13), [#allocation7]  }
  0x30   : > { %v69_v4 = vld [vmem:[%s68_s19] sm:$0x1]  ;;  %152 = vst [vmem:[%s42_s15 + $0x3] sm:$0x1] %v62_v3  ;;  %s82_s21 = scalar_lea.vmem [#allocation4], %s81_s13  ;;  %35 = sbr.rel (!%p33_p13) target bundleno = 35 (0x23), region = 51 }
  0x31   : > { %154 = vst [vmem:[%s42_s15 + $0x4] sm:$0x1] %v69_v4  ;;  %v76_v5 = vld [vmem:[%s75_s20] sm:$0x1]  ;;  %s98_s26 = sshll.u32 (%p33_p13), %s248_s25, 4  ;;  %s99_s26 = int_to_ptr.vmem [resolvable:$true] %s98_s26 }
  0x32   : > { %156 = vst [vmem:[%s42_s15 + $0x5] sm:$0x1] %v76_v5  ;;  %v83_v6 = vld [vmem:[%s82_s21] sm:$0x1]  ;;  %s208_s28 = scalar_lea.vmem (%p33_p13), %s99_s26, 256  ;;  %p213_p1 = scmp.lt.s32.totalorder (%p33_p13), %s99_s26, %s99_s26 }
  0x33   : > { %158 = vst [vmem:[%s42_s15 + $0x6] sm:$0x1] %v83_v6  ;;  %s89_s22 = scalar_lea.vmem [#allocation4], %s88_s17  ;;  %p209_p0 = scmp.ne.s32.totalorder (%p33_p13), %s99_s26, %s208_s28 }
  0x34   : > { %v90_v7 = vld [vmem:[%s89_s22] sm:$0x1]  ;;  %p214_p2 = scmp.lt.s32.totalorder (%p33_p13), %s208_s28, %s208_s28 }
  0x35   : > { %160 = vst [vmem:[%s42_s15 + $0x7] sm:$0x1] %v90_v7 }
  0x36   :  { %p215_p3 = por (%p33_p13), %p214_p2, %p213_p1 }
  0x38   :  { %p216_p4 = pnand %p215_p3, %p209_p0 }
  0x3a   :  { %219 = shalt.err (!%p216_p4)
}
  0x3b   :  { %s220_s3 = scalar_lea.hbm %s308_s2, 256 }
  0x3c   :  { %p221_p5 = scmp.ne.s32.totalorder %s308_s2, %s220_s3  ;;  %p224_p6 = scmp.lt.u32.totalorder %s220_s3, %s308_s2 }
  0x3e   :  { %p226_p7 = pnand %p224_p6, %p221_p5 }
  0x40   :  { %229 = shalt.err (!%p226_p7)
}
  0x41   :  { %104 = dma.vmem_to_hbm [thread:$0]  %s99_s26, 256, %s308_s2, [#allocation6], %s246_s23, %s246_s23, %s247_s24  }
  0x42   :  { %238 = dma.done.wait [#allocation6], 256  }
  0x43   :  { %239 = vsyncadd [#allocation6], 4294967040 }
  0x44   :  { %108 = vsyncpa [#allocation5], 1 }
  0x45   :  { %109 = vsyncpa [#allocation6], 1 }

</bundles_post_ra>
